<compile_context>
chip_gen: v6e
topology: v6e:2x2x1
jax: 0.10.0
libtpu: 0.0.40
codegen_flags: <defaults>
</compile_context>

<pallas_src>
import functools

import jax
import jax.numpy as jnp
import numpy as np
from jax.experimental import pallas as pl
from jax.experimental.pallas import tpu as pltpu

_A = 0.492
_B = 0.2887
_C = 1.1893

_LANES = 128
_ROW_UNIT = 32          # int8 sublane tile => pad rows to a multiple of 32
_MAX_TILE_R = 1024      # 512 KiB f32 block; 85%+ of roofline, VMEM-safe on v7x


def _kde_sp_kernel(x_ref, lbl_ref, out_ref, ts_ref, tc_ref, gs_ref, gc_ref, *,
                   bandwidth, tau, num_groups, n_valid, n_group_acc):
    i = pl.program_id(0)
    tile_r = x_ref.shape[0]

    @pl.when(i == 0)
    def _init():
        ts_ref[...] = jnp.zeros_like(ts_ref)
        tc_ref[...] = jnp.zeros_like(tc_ref)
        gs_ref[...] = jnp.zeros_like(gs_ref)
        gc_ref[...] = jnp.zeros_like(gc_ref)

    inv_bw = 1.0 / bandwidth
    tau_over_bw = tau / bandwidth

    x = x_ref[...]                                   # (TILE_R, 128) f32
    lblf = lbl_ref[...].astype(jnp.float32)          # int8 -> f32

    # Global flat index of every element in this block -> tail/padding mask.
    r_ids = jax.lax.broadcasted_iota(jnp.int32, (tile_r, _LANES), 0)
    c_ids = jax.lax.broadcasted_iota(jnp.int32, (tile_r, _LANES), 1)
    flat = (i * tile_r + r_ids) * _LANES + c_ids
    valid = flat < n_valid

    # KDE CDF kernel value with a single exp per element.
    xt = tau_over_bw - x * inv_bw
    s = jnp.abs(xt)
    q = jnp.exp(-(_A * s * s + _B * s + _C))
    f = jnp.where(xt > 0, q, 1.0 - q)
    f = jnp.where(xt == 0, 0.5, f)

    # where-based masking is NaN/garbage safe for padded / partial-block data.
    fv = jnp.where(valid, f, 0.0)
    vf = valid.astype(jnp.float32)
    lblm = jnp.where(valid, lblf, -1.0)              # invalid -> group "-1"

    def part(a):  # (TILE_R,128) -> (8,128): pure vreg adds, no cross-lane work
        return jnp.sum(a.reshape(tile_r // 8, 8, _LANES), axis=0)

    ts_ref[...] += part(fv)
    tc_ref[...] += part(vf)
    for g in range(n_group_acc):
        gm = jnp.where(lblm == float(g), 1.0, 0.0)
        gs_ref[g, :, :] += part(gm * fv)
        gc_ref[g, :, :] += part(gm)

    @pl.when(i == pl.num_programs(0) - 1)
    def _finish():
        def full(a):                                  # (8,128) -> (1,1)
            return jnp.sum(a, axis=(0, 1), keepdims=True)

        tot_sum = full(ts_ref[...])
        tot_cnt = full(tc_ref[...])
        p_y = tot_sum / tot_cnt

        if num_groups == 2:
            # labels assumed in {0,1}: derive group-1 stats from the totals.
            g0s = full(gs_ref[0, :, :])
            g0c = full(gc_ref[0, :, :])
            pairs = [(g0s, g0c), (tot_sum - g0s, tot_cnt - g0c)]
        else:
            pairs = [(full(gs_ref[g, :, :]), full(gc_ref[g, :, :]))
                     for g in range(num_groups)]

        res = jnp.zeros((1, 1), jnp.float32)
        for gsum, gcnt in pairs:
            p_y_s = gsum / jnp.maximum(gcnt, 1.0)
            # absent groups (count == 0) contribute nothing, matching the
            # PyTorch `set(sensitive_labels.tolist())` loop.
            res = res + jnp.where(gcnt > 0, jnp.abs(p_y_s - p_y), 0.0)

        out_ref[...] = jnp.broadcast_to(res, out_ref.shape)


def group_fairness_kde(output, sensitive_labels, bandwidth=0.1, tau=0.5,
                       num_groups=2):
    """JAX/Pallas equivalent of GroupFairnessKDE.forward (delta unused there).

    num_groups must be > max(sensitive_labels); labels >= num_groups are
    ignored (the reference iterates over the set of labels actually present).
    """
    x = output.reshape(-1).astype(jnp.float32)
    lbl = sensitive_labels.reshape(-1).astype(jnp.int8)
    n = int(x.shape[0])

    unit = _ROW_UNIT * _LANES                        # 4096 elements
    n_padded = ((n + unit - 1) // unit) * unit
    if n_padded != n:                                # skip the copy when aligned
        x = jnp.pad(x, (0, n_padded - n))
        lbl = jnp.pad(lbl, (0, n_padded - n))
    rows = n_padded // _LANES
    x2d = x.reshape(rows, _LANES)
    l2d = lbl.reshape(rows, _LANES)

    tile_r = min(_MAX_TILE_R, rows)                  # rows % 32 == 0 => tile too
    nblocks = pl.cdiv(rows, tile_r)                  # partial last block is OK

    n_group_acc = 1 if int(num_groups) == 2 else int(num_groups)

    kernel = functools.partial(
        _kde_sp_kernel,
        bandwidth=float(bandwidth), tau=float(tau),
        num_groups=int(num_groups), n_valid=n, n_group_acc=n_group_acc)

    out = pl.pallas_call(
        kernel,
        out_shape=jax.ShapeDtypeStruct((8, _LANES), jnp.float32),
        grid_spec=pltpu.PrefetchScalarGridSpec(
            num_scalar_prefetch=0,
            grid=(nblocks,),
            in_specs=[
                pl.BlockSpec((tile_r, _LANES), lambda i: (i, 0)),
                pl.BlockSpec((tile_r, _LANES), lambda i: (i, 0)),
            ],
            out_specs=pl.BlockSpec((8, _LANES), lambda i: (0, 0)),
            scratch_shapes=[
                pltpu.VMEM((8, _LANES), jnp.float32),                # tot sum
                pltpu.VMEM((8, _LANES), jnp.float32),                # tot cnt
                pltpu.VMEM((n_group_acc, 8, _LANES), jnp.float32),   # grp sums
                pltpu.VMEM((n_group_acc, 8, _LANES), jnp.float32),   # grp cnts
            ]),
        compiler_params=pltpu.CompilerParams(
            dimension_semantics=("arbitrary",)),
    )(x2d, l2d)
    return out[0, 0]


def _reference(output, labels, bandwidth=0.1, tau=0.5):
    """Pure numpy re-implementation of the PyTorch forward (for checking)."""
    output = np.asarray(output, dtype=np.float64)
    labels = np.asarray(labels)

    def q(x):
        return np.exp(-_A * x ** 2 - _B * x - _C)

    def cdf(o):
        xt = (tau - o) / bandwidth
        t1 = np.sum(q(xt[xt > 0]))
        t2 = np.sum(1.0 - q(np.abs(xt[xt < 0])))
        t3 = np.sum(xt == 0)
        return (t1 + t2 + 0.5 * t3) / len(o)

    p_y = cdf(output)
    res = 0.0
    for g in sorted(set(labels.tolist())):
        res += abs(cdf(output[labels == g]) - p_y)
    return res


if __name__ == "__main__":
    key = jax.random.PRNGKey(0)
    k1, k2, k3, k4, k5, k6 = jax.random.split(key, 6)

    # Small case matching typical module use: scores in (0,1), binary group.
    batch = 8
    output = jax.random.uniform(k1, (batch,), dtype=jnp.float32)
    labels = jax.random.bernoulli(k2, 0.5, (batch,)).astype(jnp.int32)
    res = jax.block_until_ready(group_fairness_kde(output, labels, 0.1, 0.5))
    ref = _reference(np.array(output), np.array(labels), 0.1, 0.5)
    assert np.allclose(float(res), ref, rtol=1e-4, atol=1e-5), (float(res), ref)

    # Unaligned length + 3 groups: exercises tail masking + general group path.
    n2 = 3000
    out2 = jax.random.uniform(k3, (n2,), dtype=jnp.float32)
    lbl2 = jax.random.randint(k4, (n2,), 0, 3).astype(jnp.int32)
    res2 = jax.block_until_ready(
        group_fairness_kde(out2, lbl2, 0.1, 0.5, num_groups=3))
    ref2 = _reference(np.array(out2), np.array(lbl2), 0.1, 0.5)
    assert np.allclose(float(res2), ref2, rtol=1e-4, atol=1e-5), (float(res2), ref2)

    # Multi-block path with a partial last block (rows > tile_r).
    n3 = 150000
    out3 = jax.random.uniform(k5, (n3,), dtype=jnp.float32)
    lbl3 = jax.random.bernoulli(k6, 0.3, (n3,)).astype(jnp.int32)
    res3 = jax.block_until_ready(group_fairness_kde(out3, lbl3, 0.1, 0.5))
    ref3 = _reference(np.array(out3), np.array(lbl3), 0.1, 0.5)
    assert np.allclose(float(res3), ref3, rtol=1e-4, atol=1e-5), (float(res3), ref3)

    print("KERNEL_OK")
</pallas_src>

<mosaic_0001>
module attributes {stable_mosaic.version = 11 : i64} {
  func.func @_kde_sp_kernel(%arg0: i32, %arg1: memref<32x128xf32, #tpu.memory_space<vmem>>, %arg2: memref<32x128xi8, #tpu.memory_space<vmem>>, %arg3: memref<8x128xf32, #tpu.memory_space<vmem>>, %arg4: memref<8x128xf32, #tpu.memory_space<vmem>>, %arg5: memref<8x128xf32, #tpu.memory_space<vmem>>, %arg6: memref<1x8x128xf32, #tpu.memory_space<vmem>>, %arg7: memref<1x8x128xf32, #tpu.memory_space<vmem>>) attributes {dimension_semantics = [#tpu.dimension_semantics<arbitrary>], iteration_bounds = array<i64: 1>, scalar_prefetch = 0 : i64, scratch_operands = 4 : i64, tpu.core_type = #tpu.core_type<tc>, window_params = [{transform_indices = @transform_0, window_bounds = array<i64: 32, 128>}, {transform_indices = @transform_1, window_bounds = array<i64: 32, 128>}, {pipeline_mode = #tpu.pipeline_mode<synchronous>, transform_indices = @transform_2, window_bounds = array<i64: 8, 128>}]} {
    %c0_i32 = arith.constant 0 : i32
    %0 = arith.cmpi eq, %arg0, %c0_i32 : i32
    %1 = arith.extui %0 : i1 to i32
    %c0_i32_0 = arith.constant 0 : i32
    %2 = arith.cmpi ne, %1, %c0_i32_0 : i32
    scf.if %2 {
      %cst_44 = arith.constant 0.000000e+00 : f32
      %82 = vector.broadcast %cst_44 : f32 to vector<8x128xf32>
      %c0_45 = arith.constant 0 : index
      %c0_46 = arith.constant 0 : index
      %83 = vector.load %arg4[%c0_45, %c0_46] : memref<8x128xf32, #tpu.memory_space<vmem>>, vector<8x128xf32>
      tpu.vector_store %arg4[%c0_45, %c0_46], %82 {strides = array<i32>} : memref<8x128xf32, #tpu.memory_space<vmem>>, vector<8x128xf32>,
      %cst_47 = arith.constant 0.000000e+00 : f32
      %84 = vector.broadcast %cst_47 : f32 to vector<8x128xf32>
      %c0_48 = arith.constant 0 : index
      %c0_49 = arith.constant 0 : index
      %85 = vector.load %arg5[%c0_48, %c0_49] : memref<8x128xf32, #tpu.memory_space<vmem>>, vector<8x128xf32>
      tpu.vector_store %arg5[%c0_48, %c0_49], %84 {strides = array<i32>} : memref<8x128xf32, #tpu.memory_space<vmem>>, vector<8x128xf32>,
      %cst_50 = arith.constant 0.000000e+00 : f32
      %86 = vector.broadcast %cst_50 : f32 to vector<1x8x128xf32>
      %c0_51 = arith.constant 0 : index
      %c0_52 = arith.constant 0 : index
      %c0_53 = arith.constant 0 : index
      %87 = vector.load %arg6[%c0_51, %c0_52, %c0_53] : memref<1x8x128xf32, #tpu.memory_space<vmem>>, vector<1x8x128xf32>
      tpu.vector_store %arg6[%c0_51, %c0_52, %c0_53], %86 {strides = array<i32>} : memref<1x8x128xf32, #tpu.memory_space<vmem>>, vector<1x8x128xf32>,
      %cst_54 = arith.constant 0.000000e+00 : f32
      %88 = vector.broadcast %cst_54 : f32 to vector<1x8x128xf32>
      %c0_55 = arith.constant 0 : index
      %c0_56 = arith.constant 0 : index
      %c0_57 = arith.constant 0 : index
      %89 = vector.load %arg7[%c0_55, %c0_56, %c0_57] : memref<1x8x128xf32, #tpu.memory_space<vmem>>, vector<1x8x128xf32>
      tpu.vector_store %arg7[%c0_55, %c0_56, %c0_57], %88 {strides = array<i32>} : memref<1x8x128xf32, #tpu.memory_space<vmem>>, vector<1x8x128xf32>,
    } else {
    }
    %c0 = arith.constant 0 : index
    %c0_1 = arith.constant 0 : index
    %3 = vector.load %arg1[%c0, %c0_1] : memref<32x128xf32, #tpu.memory_space<vmem>>, vector<32x128xf32>
    %c0_2 = arith.constant 0 : index
    %c0_3 = arith.constant 0 : index
    %4 = vector.load %arg2[%c0_2, %c0_3] : memref<32x128xi8, #tpu.memory_space<vmem>>, vector<32x128xi8>
    %5 = arith.sitofp %4 : vector<32x128xi8> to vector<32x128xf32>
    %6 = tpu.iota {dimensions = array<i32: 0>} : vector<32x128xi32>
    %7 = tpu.iota {dimensions = array<i32: 1>} : vector<32x128xi32>
    %c32_i32 = arith.constant 32 : i32
    %8 = arith.muli %arg0, %c32_i32 : i32
    %9 = vector.broadcast %8 : i32 to vector<32x128xi32>
    %10 = arith.addi %9, %6 : vector<32x128xi32>
    %c128_i32 = arith.constant 128 : i32
    %11 = vector.broadcast %c128_i32 : i32 to vector<32x128xi32>
    %12 = arith.muli %10, %11 : vector<32x128xi32>
    %13 = arith.addi %12, %7 : vector<32x128xi32>
    %c8_i32 = arith.constant 8 : i32
    %14 = vector.broadcast %c8_i32 : i32 to vector<32x128xi32>
    %15 = arith.cmpi slt, %13, %14 : vector<32x128xi32>
    %cst = arith.constant 1.000000e+01 : f32
    %16 = vector.broadcast %cst : f32 to vector<32x128xf32>
    %17 = arith.mulf %3, %16 : vector<32x128xf32>
    %cst_4 = arith.constant 5.000000e+00 : f32
    %18 = vector.broadcast %cst_4 : f32 to vector<32x128xf32>
    %19 = arith.subf %18, %17 : vector<32x128xf32>
    %20 = math.absf %19 : vector<32x128xf32>
    %cst_5 = arith.constant 4.920000e-01 : f32
    %21 = vector.broadcast %cst_5 : f32 to vector<32x128xf32>
    %22 = arith.mulf %21, %20 : vector<32x128xf32>
    %23 = arith.mulf %22, %20 : vector<32x128xf32>
    %cst_6 = arith.constant 2.887000e-01 : f32
    %24 = vector.broadcast %cst_6 : f32 to vector<32x128xf32>
    %25 = arith.mulf %24, %20 : vector<32x128xf32>
    %26 = arith.addf %23, %25 : vector<32x128xf32>
    %cst_7 = arith.constant 1.189300e+00 : f32
    %27 = vector.broadcast %cst_7 : f32 to vector<32x128xf32>
    %28 = arith.addf %26, %27 : vector<32x128xf32>
    %cst_8 = arith.constant 0.000000e+00 : f32
    %29 = vector.broadcast %cst_8 : f32 to vector<32x128xf32>
    %30 = arith.subf %29, %28 : vector<32x128xf32>
    %31 = math.exp %30 : vector<32x128xf32>
    %cst_9 = arith.constant 0.000000e+00 : f32
    %32 = vector.broadcast %cst_9 : f32 to vector<32x128xf32>
    %33 = arith.cmpf ogt, %19, %32 : vector<32x128xf32>
    %cst_10 = arith.constant 1.000000e+00 : f32
    %34 = vector.broadcast %cst_10 : f32 to vector<32x128xf32>
    %35 = arith.subf %34, %31 : vector<32x128xf32>
    %36 = arith.select %33, %31, %35 : vector<32x128xi1>, vector<32x128xf32>
    %cst_11 = arith.constant 0.000000e+00 : f32
    %37 = vector.broadcast %cst_11 : f32 to vector<32x128xf32>
    %38 = arith.cmpf oeq, %19, %37 : vector<32x128xf32>
    %cst_12 = arith.constant 5.000000e-01 : f32
    %39 = vector.broadcast %cst_12 : f32 to vector<32x128xf32>
    %40 = arith.select %38, %39, %36 : vector<32x128xi1>, vector<32x128xf32>
    %cst_13 = arith.constant 0.000000e+00 : f32
    %41 = vector.broadcast %cst_13 : f32 to vector<32x128xf32>
    %42 = arith.select %15, %40, %41 : vector<32x128xi1>, vector<32x128xf32>
    %43 = arith.extui %15 : vector<32x128xi1> to vector<32x128xi32>
    %44 = arith.sitofp %43 : vector<32x128xi32> to vector<32x128xf32>
    %cst_14 = arith.constant -1.000000e+00 : f32
    %45 = vector.broadcast %cst_14 : f32 to vector<32x128xf32>
    %46 = arith.select %15, %5, %45 : vector<32x128xi1>, vector<32x128xf32>
    %c0_15 = arith.constant 0 : index
    %c0_16 = arith.constant 0 : index
    %47 = vector.load %arg4[%c0_15, %c0_16] : memref<8x128xf32, #tpu.memory_space<vmem>>, vector<8x128xf32>
    %48 = vector.shape_cast %42 : vector<32x128xf32> to vector<4x8x128xf32>
    %cst_17 = arith.constant dense<0.000000e+00> : vector<8x128xf32>
    %49 = vector.multi_reduction <add>, %48, %cst_17 [0] : vector<4x8x128xf32> to vector<8x128xf32>
    %50 = arith.addf %47, %49 : vector<8x128xf32>
    %c0_18 = arith.constant 0 : index
    %c0_19 = arith.constant 0 : index
    %51 = vector.load %arg4[%c0_18, %c0_19] : memref<8x128xf32, #tpu.memory_space<vmem>>, vector<8x128xf32>
    tpu.vector_store %arg4[%c0_18, %c0_19], %50 {strides = array<i32>} : memref<8x128xf32, #tpu.memory_space<vmem>>, vector<8x128xf32>,
    %c0_20 = arith.constant 0 : index
    %c0_21 = arith.constant 0 : index
    %52 = vector.load %arg5[%c0_20, %c0_21] : memref<8x128xf32, #tpu.memory_space<vmem>>, vector<8x128xf32>
    %53 = vector.shape_cast %44 : vector<32x128xf32> to vector<4x8x128xf32>
    %cst_22 = arith.constant dense<0.000000e+00> : vector<8x128xf32>
    %54 = vector.multi_reduction <add>, %53, %cst_22 [0] : vector<4x8x128xf32> to vector<8x128xf32>
    %55 = arith.addf %52, %54 : vector<8x128xf32>
    %c0_23 = arith.constant 0 : index
    %c0_24 = arith.constant 0 : index
    %56 = vector.load %arg5[%c0_23, %c0_24] : memref<8x128xf32, #tpu.memory_space<vmem>>, vector<8x128xf32>
    tpu.vector_store %arg5[%c0_23, %c0_24], %55 {strides = array<i32>} : memref<8x128xf32, #tpu.memory_space<vmem>>, vector<8x128xf32>,
    %cst_25 = arith.constant 0.000000e+00 : f32
    %57 = vector.broadcast %cst_25 : f32 to vector<32x128xf32>
    %58 = arith.cmpf oeq, %46, %57 : vector<32x128xf32>
    %cst_26 = arith.constant 1.000000e+00 : f32
    %cst_27 = arith.constant 0.000000e+00 : f32
    %59 = vector.broadcast %cst_26 : f32 to vector<32x128xf32>
    %60 = vector.broadcast %cst_27 : f32 to vector<32x128xf32>
    %61 = arith.select %58, %59, %60 : vector<32x128xi1>, vector<32x128xf32>
    %c0_28 = arith.constant 0 : index
    %c0_29 = arith.constant 0 : index
    %c0_30 = arith.constant 0 : index
    %62 = vector.load %arg6[%c0_28, %c0_29, %c0_30] : memref<1x8x128xf32, #tpu.memory_space<vmem>>, vector<1x8x128xf32>
    %63 = vector.shape_cast %62 : vector<1x8x128xf32> to vector<8x128xf32>
    %64 = arith.mulf %61, %42 : vector<32x128xf32>
    %65 = vector.shape_cast %64 : vector<32x128xf32> to vector<4x8x128xf32>
    %cst_31 = arith.constant dense<0.000000e+00> : vector<8x128xf32>
    %66 = vector.multi_reduction <add>, %65, %cst_31 [0] : vector<4x8x128xf32> to vector<8x128xf32>
    %67 = arith.addf %63, %66 : vector<8x128xf32>
    %c0_32 = arith.constant 0 : index
    %c0_33 = arith.constant 0 : index
    %c0_34 = arith.constant 0 : index
    %68 = vector.load %arg6[%c0_32, %c0_33, %c0_34] : memref<1x8x128xf32, #tpu.memory_space<vmem>>, vector<1x8x128xf32>
    %69 = vector.shape_cast %68 : vector<1x8x128xf32> to vector<8x128xf32>
    %70 = vector.shape_cast %67 : vector<8x128xf32> to vector<1x8x128xf32>
    tpu.vector_store %arg6[%c0_32, %c0_33, %c0_34], %70 {strides = array<i32>} : memref<1x8x128xf32, #tpu.memory_space<vmem>>, vector<1x8x128xf32>,
    %c0_35 = arith.constant 0 : index
    %c0_36 = arith.constant 0 : index
    %c0_37 = arith.constant 0 : index
    %71 = vector.load %arg7[%c0_35, %c0_36, %c0_37] : memref<1x8x128xf32, #tpu.memory_space<vmem>>, vector<1x8x128xf32>
    %72 = vector.shape_cast %71 : vector<1x8x128xf32> to vector<8x128xf32>
    %73 = vector.shape_cast %61 : vector<32x128xf32> to vector<4x8x128xf32>
    %cst_38 = arith.constant dense<0.000000e+00> : vector<8x128xf32>
    %74 = vector.multi_reduction <add>, %73, %cst_38 [0] : vector<4x8x128xf32> to vector<8x128xf32>
    %75 = arith.addf %72, %74 : vector<8x128xf32>
    %c0_39 = arith.constant 0 : index
    %c0_40 = arith.constant 0 : index
    %c0_41 = arith.constant 0 : index
    %76 = vector.load %arg7[%c0_39, %c0_40, %c0_41] : memref<1x8x128xf32, #tpu.memory_space<vmem>>, vector<1x8x128xf32>
    %77 = vector.shape_cast %76 : vector<1x8x128xf32> to vector<8x128xf32>
    %78 = vector.shape_cast %75 : vector<8x128xf32> to vector<1x8x128xf32>
    tpu.vector_store %arg7[%c0_39, %c0_40, %c0_41], %78 {strides = array<i32>} : memref<1x8x128xf32, #tpu.memory_space<vmem>>, vector<1x8x128xf32>,
    %c0_i32_42 = arith.constant 0 : i32
    %79 = arith.cmpi eq, %arg0, %c0_i32_42 : i32
    %80 = arith.extui %79 : i1 to i32
    %c0_i32_43 = arith.constant 0 : i32
    %81 = arith.cmpi ne, %80, %c0_i32_43 : i32
    scf.if %81 {
      %c0_44 = arith.constant 0 : index
      %c0_45 = arith.constant 0 : index
      %82 = vector.load %arg4[%c0_44, %c0_45] : memref<8x128xf32, #tpu.memory_space<vmem>>, vector<8x128xf32>
      %83 = vector.shape_cast %82 : vector<8x128xf32> to vector<1x8x128xf32>
      %cst_46 = arith.constant dense<0.000000e+00> : vector<1xf32>
      %84 = vector.multi_reduction <add>, %83, %cst_46 [1, 2] : vector<1x8x128xf32> to vector<1xf32>
      %85 = vector.shape_cast %84 : vector<1xf32> to vector<1x1x1xf32>
      %86 = vector.extract %85[0, 0, 0] : f32 from vector<1x1x1xf32>
      %87 = vector.broadcast %86 : f32 to vector<1x1xf32>
      %c0_47 = arith.constant 0 : index
      %c0_48 = arith.constant 0 : index
      %88 = vector.load %arg5[%c0_47, %c0_48] : memref<8x128xf32, #tpu.memory_space<vmem>>, vector<8x128xf32>
      %89 = vector.shape_cast %88 : vector<8x128xf32> to vector<1x8x128xf32>
      %cst_49 = arith.constant dense<0.000000e+00> : vector<1xf32>
      %90 = vector.multi_reduction <add>, %89, %cst_49 [1, 2] : vector<1x8x128xf32> to vector<1xf32>
      %91 = vector.shape_cast %90 : vector<1xf32> to vector<1x1x1xf32>
      %92 = vector.extract %91[0, 0, 0] : f32 from vector<1x1x1xf32>
      %93 = vector.broadcast %92 : f32 to vector<1x1xf32>
      %94 = arith.divf %87, %93 : vector<1x1xf32>
      %c0_50 = arith.constant 0 : index
      %c0_51 = arith.constant 0 : index
      %c0_52 = arith.constant 0 : index
      %95 = vector.load %arg6[%c0_50, %c0_51, %c0_52] : memref<1x8x128xf32, #tpu.memory_space<vmem>>, vector<1x8x128xf32>
      %96 = vector.shape_cast %95 : vector<1x8x128xf32> to vector<8x128xf32>
      %97 = vector.shape_cast %96 : vector<8x128xf32> to vector<1x8x128xf32>
      %cst_53 = arith.constant dense<0.000000e+00> : vector<1xf32>
      %98 = vector.multi_reduction <add>, %97, %cst_53 [1, 2] : vector<1x8x128xf32> to vector<1xf32>
      %99 = vector.shape_cast %98 : vector<1xf32> to vector<1x1x1xf32>
      %100 = vector.extract %99[0, 0, 0] : f32 from vector<1x1x1xf32>
      %101 = vector.broadcast %100 : f32 to vector<1x1xf32>
      %c0_54 = arith.constant 0 : index
      %c0_55 = arith.constant 0 : index
      %c0_56 = arith.constant 0 : index
      %102 = vector.load %arg7[%c0_54, %c0_55, %c0_56] : memref<1x8x128xf32, #tpu.memory_space<vmem>>, vector<1x8x128xf32>
      %103 = vector.shape_cast %102 : vector<1x8x128xf32> to vector<8x128xf32>
      %104 = vector.shape_cast %103 : vector<8x128xf32> to vector<1x8x128xf32>
      %cst_57 = arith.constant dense<0.000000e+00> : vector<1xf32>
      %105 = vector.multi_reduction <add>, %104, %cst_57 [1, 2] : vector<1x8x128xf32> to vector<1xf32>
      %106 = vector.shape_cast %105 : vector<1xf32> to vector<1x1x1xf32>
      %107 = vector.extract %106[0, 0, 0] : f32 from vector<1x1x1xf32>
      %108 = vector.broadcast %107 : f32 to vector<1x1xf32>
      %109 = arith.subf %87, %101 : vector<1x1xf32>
      %110 = arith.subf %93, %108 : vector<1x1xf32>
      %cst_58 = arith.constant 0.000000e+00 : f32
      %111 = vector.broadcast %cst_58 : f32 to vector<1x1xf32>
      %cst_59 = arith.constant 1.000000e+00 : f32
      %112 = vector.broadcast %cst_59 : f32 to vector<1x1xf32>
      %113 = arith.maximumf %108, %112 : vector<1x1xf32>
      %114 = arith.divf %101, %113 : vector<1x1xf32>
      %cst_60 = arith.constant 0.000000e+00 : f32
      %115 = vector.broadcast %cst_60 : f32 to vector<1x1xf32>
      %116 = arith.cmpf ogt, %108, %115 : vector<1x1xf32>
      %117 = arith.subf %114, %94 : vector<1x1xf32>
      %118 = math.absf %117 : vector<1x1xf32>
      %cst_61 = arith.constant 0.000000e+00 : f32
      %119 = vector.broadcast %cst_61 : f32 to vector<1x1xf32>
      %120 = arith.select %116, %118, %119 : vector<1x1xi1>, vector<1x1xf32>
      %121 = arith.addf %111, %120 : vector<1x1xf32>
      %cst_62 = arith.constant 1.000000e+00 : f32
      %122 = vector.broadcast %cst_62 : f32 to vector<1x1xf32>
      %123 = arith.maximumf %110, %122 : vector<1x1xf32>
      %124 = arith.divf %109, %123 : vector<1x1xf32>
      %cst_63 = arith.constant 0.000000e+00 : f32
      %125 = vector.broadcast %cst_63 : f32 to vector<1x1xf32>
      %126 = arith.cmpf ogt, %110, %125 : vector<1x1xf32>
      %127 = arith.subf %124, %94 : vector<1x1xf32>
      %128 = math.absf %127 : vector<1x1xf32>
      %cst_64 = arith.constant 0.000000e+00 : f32
      %129 = vector.broadcast %cst_64 : f32 to vector<1x1xf32>
      %130 = arith.select %126, %128, %129 : vector<1x1xi1>, vector<1x1xf32>
      %131 = arith.addf %121, %130 : vector<1x1xf32>
      %132 = vector.shape_cast %131 : vector<1x1xf32> to vector<1x1xf32>
      %133 = vector.broadcast %132 : vector<1x1xf32> to vector<8x128xf32>
      %c0_65 = arith.constant 0 : index
      %c0_66 = arith.constant 0 : index
      %134 = vector.load %arg3[%c0_65, %c0_66] : memref<8x128xf32, #tpu.memory_space<vmem>>, vector<8x128xf32>
      tpu.vector_store %arg3[%c0_65, %c0_66], %133 {strides = array<i32>} : memref<8x128xf32, #tpu.memory_space<vmem>>, vector<8x128xf32>,
    } else {
    }
    return
  }
  func.func @transform_0(%arg0: i32) -> (i32, i32) {
    %c0_i32 = arith.constant 0 : i32
    %c0_i32_0 = arith.constant 0 : i32
    return %arg0, %c0_i32 : i32, i32
  }
  func.func @transform_1(%arg0: i32) -> (i32, i32) {
    %c0_i32 = arith.constant 0 : i32
    %c0_i32_0 = arith.constant 0 : i32
    return %arg0, %c0_i32 : i32, i32
  }
  func.func @transform_2(%arg0: i32) -> (i32, i32) {
    %c0_i32 = arith.constant 0 : i32
    %c0_i32_0 = arith.constant 0 : i32
    %c0_i32_1 = arith.constant 0 : i32
    return %c0_i32, %c0_i32_0 : i32, i32
  }
}

</mosaic_0001>

<bundles_post_ra>
// kernel: tpu_custom_call.1
= control target key start
LH: loop header
LB: loop body
LE: loop exit
PB: predicated region body
PF: predicated region fallthrough
CT: control target
= control target key end

     0   :  { %7 = vsyncpa [#allocation7], 0  ;;  %s469_s0 = inlined_call_operand.hbm [shape: f32[32,128], index: 0, kind: input, shape index: {}]   ;;  %s470_s1 = inlined_call_operand.hbm [shape: s8[32,128], index: 1, kind: input, shape index: {}]   ;;  %s471_s2 = inlined_call_operand.hbm [shape: f32[8,128], index: 2, kind: output, shape index: {}]  }
   0x1   :  { %8 = vsyncpa [#allocation10], 0 }
   0x2   :  { %9 = vsyncpa [#allocation8], 0  ;;  %s382_s9 = smov [#allocation6]  }
   0x3   :  { %s15_s10 = sshll.u32 %s382_s9, 4  ;;  %s16_s10 = int_to_ptr.vmem [resolvable:$true] %s15_s10 }
   0x4   :  { %s324_s11 = scalar_lea.vmem %s16_s10, 512  ;;  %p329_p1 = scmp.lt.s32.totalorder %s16_s10, %s16_s10 }
   0x5   :  { %p325_p0 = scmp.ne.s32.totalorder %s16_s10, %s324_s11  ;;  %p330_p2 = scmp.lt.s32.totalorder %s324_s11, %s324_s11 }
   0x7   :  { %p331_p3 = por %p330_p2, %p329_p1 }
   0x9   :  { %p332_p4 = pnand %p331_p3, %p325_p0 }
   0xb   :  { %335 = shalt.err (!%p332_p4)
}
   0xc   :  { %s383_s12 = smov 128   ;;  %s384_s13 = smov 8  }
   0xd   :  { %21 = dma.hbm_to_vmem [thread:$0]  %s469_s0, 512, %s16_s10, [#allocation7], %s383_s12, %s383_s12, %s384_s13  }
   0xe   :  { %s385_s16 = smov [#allocation9]  }
   0xf   :  { %s28_s17 = sshll.u32 %s385_s16, 4  ;;  %s29_s17 = int_to_ptr.vmem [resolvable:$true] %s28_s17 }
  0x10   :  { %s344_s18 = scalar_lea.vmem %s29_s17, 128  ;;  %p349_p6 = scmp.lt.s32.totalorder %s29_s17, %s29_s17 }
  0x11   :  { %p345_p5 = scmp.ne.s32.totalorder %s29_s17, %s344_s18  ;;  %p350_p7 = scmp.lt.s32.totalorder %s344_s18, %s344_s18 }
  0x13   :  { %p351_p8 = por %p350_p7, %p349_p6 }
  0x15   :  { %p352_p9 = pnand %p351_p8, %p345_p5 }
  0x17   :  { %355 = shalt.err (!%p352_p9)
}
  0x18   :  { %31 = dma.hbm_to_vmem [thread:$0]  %s470_s1, 128, %s29_s17, [#allocation10]  }
  0x19   :  { %376 = dma.done.wait [#allocation7], 512  }
  0x1a   :  { %377 = vsyncadd [#allocation7], 4294966784 }
  0x1b   :  { %378 = dma.done.wait [#allocation10], 128  }
  0x1c   :  { %379 = vsyncadd [#allocation10], 4294967168  ;;  %v46_v0 = vld [vmem:[#allocation6] sm:$0xff]  ;;  %v47_v1 = vld [vmem:[#allocation6 + $0x8] sm:$0xff]  ;;  %v59_v8 = vlaneseq  ;;  %s387_s23 = smov [#allocation11]  }
  0x1d   :  { %v48_v2 = vld [vmem:[#allocation6 + $0x10] sm:$0xff]  ;;  %v49_v3 = vld [vmem:[#allocation6 + $0x18] sm:$0xff]  ;;  %v84_v4 = vmul.f32 10.0, %v46_v0  ;;  %v85_v5 = vmul.f32 10.0, %v47_v1  ;;  %v50_v51 = vld [vmem:[#allocation9] sm:$0xff]  ;;  %s274_s24 = sshll.u32 %s387_s23, 4  ;;  %s275_s24 = int_to_ptr.vmem [resolvable:$true] %s274_s24 }
  0x1e   :  { %v86_v6 = vmul.f32 10.0, %v48_v2  ;;  %v87_v7 = vmul.f32 10.0, %v49_v3  ;;  %v60_v17 = vshrl.u32 %v59_v8, 7  ;;  %v65_v41 = vand.u32 127, %v59_v8  ;;  %s356_s25 = scalar_lea.vmem %s275_s24, 128  ;;  %p361_p11 = scmp.lt.s32.totalorder %s275_s24, %s275_s24 }
  0x1f   :  { %v409_v9 = vsub.f32 5.0, %v84_v4  ;;  %v411_v10 = vsub.f32 5.0, %v85_v5  ;;  %v51_v56 = vunpack.c.0.s8 %v50_v51  ;;  %v52_v57 = vunpack.c.1.s8 %v50_v51  ;;  %p357_p10 = scmp.ne.s32.totalorder %s275_s24, %s356_s25  ;;  %p362_p12 = scmp.lt.s32.totalorder %s356_s25, %s356_s25 }
  0x20   :  { %v413_v11 = vsub.f32 5.0, %v86_v6  ;;  %v415_v12 = vsub.f32 5.0, %v87_v7  ;;  %v61_v31 = vadd.s32 8, %v60_v17  ;;  %v62_v35 = vadd.s32 16, %v60_v17 }
  0x21   :  { %v92_v13 = vand.u32 2147483647, %v409_v9  ;;  %v93_v14 = vand.u32 2147483647, %v411_v10  ;;  %v63_v36 = vadd.s32 24, %v60_v17  ;;  %v72_v42 = vmul.u32 128, %v60_v17  ;;  %p363_p13 = por %p362_p12, %p361_p11 }
  0x22   :  { %v94_v15 = vand.u32 2147483647, %v413_v11  ;;  %v95_v16 = vand.u32 2147483647, %v415_v12  ;;  %v73_v44 = vmul.u32 128, %v61_v31  ;;  %v74_v48 = vmul.u32 128, %v62_v35 }
  0x23   :  { %v96_v18 = vmul.f32 0.492, %v92_v13  ;;  %v104_v19 = vmul.f32 0.2887, %v92_v13  ;;  %v97_v20 = vmul.f32 0.492, %v93_v14  ;;  %v76_v55 = vadd.s32 %v72_v42, %v65_v41  ;;  %p364_p0 = pnand %p363_p13, %p357_p10 }
  0x24   :  { %v98_v21 = vmul.f32 0.492, %v94_v15  ;;  %v99_v22 = vmul.f32 0.492, %v95_v16  ;;  %v105_v24 = vmul.f32 0.2887, %v93_v14  ;;  %v53_v58 = vunpack.c.2.s8 %v50_v51 }
  0x25   :  { %v100_v23 = vmul.f32 %v96_v18, %v92_v13  ;;  %v106_v25 = vmul.f32 0.2887, %v94_v15  ;;  %v107_v26 = vmul.f32 0.2887, %v95_v16  ;;  %v101_v27 = vmul.f32 %v97_v20, %v93_v14 }
  0x26   :  { %v102_v28 = vmul.f32 %v98_v21, %v94_v15  ;;  %v103_v29 = vmul.f32 %v99_v22, %v95_v16  ;;  %v75_v49 = vmul.u32 128, %v63_v36  ;;  %v77_v59 = vadd.s32 %v73_v44, %v65_v41 }
  0x27   :  { %v108_v30 = vadd.f32 %v104_v19, %v100_v23  ;;  %v109_v32 = vadd.f32 %v105_v24, %v101_v27  ;;  %v78_v60 = vadd.s32 %v74_v48, %v65_v41  ;;  %v54_v61 = vunpack.c.3.s8 %v50_v51 }
  0x28   :  { %v110_v33 = vadd.f32 %v106_v25, %v102_v28  ;;  %v111_v34 = vadd.f32 %v107_v26, %v103_v29  ;;  %v421_v62 = vadd.s32 %v75_v49, %v65_v41  ;;  %v55_v63 = vcvt.s32.f32 %v51_v56 }
  0x29   :  { %v112_v37 = vadd.f32 1.1893, %v108_v30  ;;  %v113_v38 = vadd.f32 1.1893, %v109_v32  ;;  %v56_v0 = vcvt.s32.f32 %v52_v57  ;;  %v57_v1 = vcvt.s32.f32 %v53_v58 }
  0x2a   :  { %v114_v39 = vadd.f32 1.1893, %v110_v33  ;;  %v115_v40 = vadd.f32 1.1893, %v111_v34  ;;  %vm80_vm0 = vcmp.lt.s32.totalorder %v76_v55, 8  ;;  %vm81_vm1 = vcmp.lt.s32.totalorder %v77_v59, 8 }
  0x2b   :  { %v116_v43 = vsub.f32 0.0, %v112_v37  ;;  %v117_v45 = vsub.f32 0.0, %v113_v38  ;;  %vm82_vm2 = vcmp.lt.s32.totalorder %v78_v60, 8  ;;  %v58_v2 = vcvt.s32.f32 %v54_v61 }
  0x2c   :  { %v118_v46 = vsub.f32 0.0, %v114_v39  ;;  %v119_v47 = vsub.f32 0.0, %v115_v40  ;;  %vm83_vm3 = vcmp.lt.s32.totalorder %v421_v62, 8  ;;  %v160_v3 = vsel %vm80_vm0, %v55_v63, -1.0 }
  0x2d   :  { %v120_v50 = vmul.f32 1.442695, %v116_v43  ;;  %v122_v52 = vmul.f32 1.442695, %v117_v45  ;;  %v161_v4 = vsel %vm81_vm1, %v56_v0, -1.0  ;;  %v162_v5 = vsel %vm82_vm2, %v57_v1, -1.0 }
  0x2e   :  { %v124_v53 = vmul.f32 1.442695, %v118_v46  ;;  %v126_v54 = vmul.f32 1.442695, %v119_v47  ;;  %v163_v6 = vsel %vm83_vm3, %v58_v2, -1.0  ;;  %vm128_vm4 = vcmp.gt.f32.partialorder %v409_v9, 0.0 }
  0x2f   :  { %302 = vpow2.f32 %v120_v50  ;;  %vm129_vm5 = vcmp.gt.f32.partialorder %v411_v10, 0.0  ;;  %vm140_vm6 = vcmp.eq.f32.partialorder %v409_v9, 0.0  ;;  %vm130_vm7 = vcmp.gt.f32.partialorder %v413_v11, 0.0 }
  0x30   :  { %304 = vpow2.f32 %v122_v52  ;;  %vm176_vm8 = vcmp.eq.f32.partialorder %v160_v3, 0.0  ;;  %vm177_vm9 = vcmp.eq.f32.partialorder %v161_v4, 0.0  ;;  %vm178_vm10 = vcmp.eq.f32.partialorder %v162_v5, 0.0 }
  0x31   :  { %306 = vpow2.f32 %v124_v53  ;;  %vm131_vm11 = vcmp.gt.f32.partialorder %v415_v12, 0.0  ;;  %vm141_vm12 = vcmp.eq.f32.partialorder %v411_v10, 0.0  ;;  %vm142_vm13 = vcmp.eq.f32.partialorder %v413_v11, 0.0 }
  0x32   :  { %308 = vpow2.f32 %v126_v54  ;;  %vm179_vm14 = vcmp.eq.f32.partialorder %v163_v6, 0.0  ;;  %vm143_vm15 = vcmp.eq.f32.partialorder %v415_v12, 0.0  ;;  %v386_v14 = vmov 0.0  }
  0x33   :  { %v284_v15 = vsel %vm80_vm0, 1.0, %v386_v14  ;;  %v285_v16 = vsel %vm81_vm1, 1.0, %v386_v14  ;;  %v180_v19 = vsel %vm176_vm8, 1.0, %v386_v14  ;;  %v181_v20 = vsel %vm177_vm9, 1.0, %v386_v14 }
  0x34   :  { %v182_v21 = vsel %vm178_vm10, 1.0, %v386_v14  ;;  %v183_v25 = vsel %vm179_vm14, 1.0, %v386_v14  ;;  %v286_v26 = vsel %vm82_vm2, 1.0, %v386_v14  ;;  %v171_v30 = vadd.f32 %v285_v16, %v284_v15 }
  0x35   :  { %v195_v34 = vadd.f32 %v181_v20, %v180_v19  ;;  %v287_v11 = vsel %vm83_vm3, 1.0, %v386_v14 }
  0x36   :  { %v172_v46 = vadd.f32 %v286_v26, %v171_v30 }
  0x37   :  { %v196_v49 = vadd.f32 %v195_v34, %v182_v21 }
  0x38   :  { %v173_v50 = vadd.f32 %v287_v11, %v172_v46 }
  0x39   :  { %v197_v51 = vadd.f32 %v196_v49, %v183_v25 }
  0x3c   :  { %v303_v7 = vpop.eup %302 }
  0x3d   :  { %v305_v8 = vpop.eup %304  ;;  %v132_v13 = vsub.f32 1.0, %v303_v7 }
  0x3e   :  { %v307_v17 = vpop.eup %306  ;;  %v133_v18 = vsub.f32 1.0, %v305_v8 }
  0x3f   :  { %v309_v22 = vpop.eup %308  ;;  %v134_v23 = vsub.f32 1.0, %v307_v17  ;;  %v136_v24 = vsel %vm128_vm4, %v303_v7, %v132_v13 }
  0x40   :  { %v135_v27 = vsub.f32 1.0, %v309_v22  ;;  %v137_v28 = vsel %vm129_vm5, %v305_v8, %v133_v18  ;;  %v144_v29 = vsel %vm140_vm6, 0.5, %v136_v24 }
  0x41   :  { %v138_v31 = vsel %vm130_vm7, %v307_v17, %v134_v23  ;;  %v145_v32 = vsel %vm141_vm12, 0.5, %v137_v28  ;;  %v148_v33 = vsel %vm80_vm0, %v144_v29, 0.0 }
  0x42   :  { %v139_v35 = vsel %vm131_vm11, %v309_v22, %v135_v27  ;;  %v146_v36 = vsel %vm142_vm13, 0.5, %v138_v31  ;;  %v149_v37 = vsel %vm81_vm1, %v145_v32, 0.0  ;;  %v185_v9 = vmul.f32 %v180_v19, %v148_v33 }
  0x43   :  { %v147_v38 = vsel %vm143_vm15, 0.5, %v139_v35  ;;  %v150_v39 = vsel %vm82_vm2, %v146_v36, 0.0  ;;  %v165_v40 = vadd.f32 %v149_v37, %v148_v33  ;;  %v186_v10 = vmul.f32 %v181_v20, %v149_v37 }
  0x44   :  { %v151_v41 = vsel %vm83_vm3, %v147_v38, 0.0  ;;  %v187_v42 = vmul.f32 %v182_v21, %v150_v39 }
  0x45   :  { %v166_v43 = vadd.f32 %v165_v40, %v150_v39  ;;  %v188_v44 = vmul.f32 %v183_v25, %v151_v41  ;;  %v189_v45 = vadd.f32 %v186_v10, %v185_v9 }
  0x47   :  { %v167_v47 = vadd.f32 %v166_v43, %v151_v41  ;;  %v190_v48 = vadd.f32 %v189_v45, %v187_v42 }
  0x49   :  { %204 = vadd.xlane.f32.xlu0 %v167_v47  ;;  %v191_v12 = vadd.f32 %v190_v48, %v188_v44 }
  0x4b   :  { %228 = vadd.xlane.f32.xlu1 %v191_v12 }
  0x4d   :  { %215 = vadd.xlane.f32.xlu0 %v173_v50 }
  0x4f   :  { %239 = vadd.xlane.f32.xlu1 %v197_v51 }
  0xd2   :  { %v205_v52 = vpop.xlane.xlu0 %204 }
  0xd3   :  { %v206_v53 = vrot.slane %v205_v52, 4 }
  0xd4   :  { %v229_v54 = vpop.xlane.xlu1 %228 }
  0xd5   :  { %v207_v55 = vadd.f32 %v206_v53, %v205_v52  ;;  %v230_v56 = vrot.slane %v229_v54, 4 }
  0xd6   :  { %v216_v57 = vpop.xlane.xlu0 %215 }
  0xd7   :  { %v208_v58 = vrot.slane %v207_v55, 2  ;;  %v231_v59 = vadd.f32 %v230_v56, %v229_v54  ;;  %v217_v60 = vrot.slane %v216_v57, 4 }
  0xd8   :  { %v240_v61 = vpop.xlane.xlu1 %239 }
  0xd9   :  { %v232_v62 = vrot.slane %v231_v59, 2  ;;  %v218_v63 = vadd.f32 %v217_v60, %v216_v57  ;;  %v241_v0 = vrot.slane %v240_v61, 4  ;;  %v209_v1 = vadd.f32 %v208_v58, %v207_v55 }
  0xdb   :  { %v219_v2 = vrot.slane %v218_v63, 2  ;;  %v242_v3 = vadd.f32 %v241_v0, %v240_v61  ;;  %v210_v4 = vrot.slane %v209_v1, 1  ;;  %v233_v5 = vadd.f32 %v232_v62, %v231_v59 }
  0xdd   :  { %v220_v6 = vadd.f32 %v219_v2, %v218_v63  ;;  %v243_v7 = vrot.slane %v242_v3, 2  ;;  %v211_v8 = vadd.f32 %v210_v4, %v209_v1  ;;  %v234_v13 = vrot.slane %v233_v5, 1 }
  0xdf   :  { %v244_v14 = vadd.f32 %v243_v7, %v242_v3  ;;  %288 = vpush %v211_v8  ;;  %v221_v15 = vrot.slane %v220_v6, 1  ;;  %v235_v18 = vadd.f32 %v234_v13, %v233_v5 }
  0xe1   :  { %v222_v16 = vadd.f32 %v221_v15, %v220_v6  ;;  %v245_v17 = vrot.slane %v244_v14, 1 }
  0xe3   :  { %290 = vpush %v222_v16  ;;  %v246_v19 = vadd.f32 %v245_v17, %v244_v14 }
  0xe4   :  { %292 = vpush %v235_v18 }
  0xe5   :  { %294 = vpush %v246_v19 }
 0x110   :  { %s289_s0 = spop %288 }
 0x111   :  { %v213_v28 = vstv %s289_s0 }
 0x114   :  { %s291_s1 = spop %290 }
 0x115   :  { %v224_v20 = vstv %s291_s1  ;;  %s293_s21 = spop %292 }
 0x116   :  { %s295_s22 = spop %294  ;;  %310 = vrcp.f32 %v224_v20  ;;  %v237_v26 = vstv %s293_s21 }
 0x117   :  { %v248_v21 = vstv %s295_s22  ;;  %v249_v29 = vsub.f32 %v213_v28, %v237_v26 }
 0x118   :  { %v250_v22 = vsub.f32 %v224_v20, %v248_v21  ;;  %v251_v23 = vmax.f32 %v248_v21, 1.0  ;;  %vm254_vm0 = vcmp.gt.f32.partialorder %v248_v21, 0.0 }
 0x11a   :  { %312 = vrcp.f32 %v251_v23  ;;  %v259_v24 = vmax.f32 %v250_v22, 1.0  ;;  %vm262_vm1 = vcmp.gt.f32.partialorder %v250_v22, 0.0 }
 0x11c   :  { %314 = vrcp.f32 %v259_v24 }
 0x123   :  { %v311_v25 = vpop.eup %310 }
 0x124   :  { %v226_v30 = vmul.f32 %v311_v25, %v213_v28 }
 0x127   :  { %v313_v27 = vpop.eup %312 }
 0x128   :  { %v253_v31 = vmul.f32 %v313_v27, %v237_v26 }
 0x129   :  { %v315_v32 = vpop.eup %314 }
 0x12a   :  { %v255_v33 = vsub.f32 %v253_v31, %v226_v30  ;;  %v261_v34 = vmul.f32 %v315_v32, %v249_v29 }
 0x12c   :  { %v256_v35 = vand.u32 2147483647, %v255_v33  ;;  %v263_v36 = vsub.f32 %v261_v34, %v226_v30 }
 0x12e   :  { %v264_v37 = vand.u32 2147483647, %v263_v36  ;;  %v257_v9 = vsel %vm254_vm0, %v256_v35, 0.0 }
 0x130   :  { %v265_v38 = vsel %vm262_vm1, %v264_v37, 0.0 }
 0x131   :  { %v266_v39 = vadd.f32 %v265_v38, %v257_v9 }
 0x133   :  { %267 = vst [vmem:[#allocation11] sm:$0xff] %v266_v39 }
 0x134   :  { %367 = shalt.err (!%p364_p0)
}
 0x135   :  { %277 = dma.vmem_to_hbm [thread:$0]  %s275_s24, 128, %s471_s2, [#allocation8]  }
 0x136   :  { %380 = dma.done.wait [#allocation8], 128  }
 0x137   :  { %381 = vsyncadd [#allocation8], 4294967168 }
 0x138   :  { %281 = vsyncpa [#allocation7], 1 }
 0x139   :  { %282 = vsyncpa [#allocation10], 1 }
 0x13a   :  { %283 = vsyncpa [#allocation8], 1 }

</bundles_post_ra>
